<compile_context>
chip_gen: v6e
topology: v6e:2x2x1
jax: 0.10.0
libtpu: 0.0.40
codegen_flags: <defaults>
</compile_context>

<pallas_src>
import functools

import jax
import jax.numpy as jnp
from jax.experimental import pallas as pl
from jax.experimental.pallas import tpu as pltpu

_LANE_CANDIDATES = (4096, 2048, 1024, 512, 256, 128)  # wide, lane-dense widths
_MIN_TILE = 8 * 128                                    # minimal (8,128) f32 tile
_TARGET_BLOCK_BYTES = 1 << 20                          # ~1 MiB per grid block


def _fmix32(x):
    """murmur3 32-bit finalizer (strong avalanche); uint32 in, uint32 out."""
    x = x ^ (x >> 16)
    x = x * jnp.uint32(0x85EBCA6B)
    x = x ^ (x >> 13)
    x = x * jnp.uint32(0xC2B2AE35)
    x = x ^ (x >> 16)
    return x


def _dropout_kernel(seed_ref, x_ref, o_ref, *,
                    threshold_u32, inv_keep_prob, block_rows, lane_width):
    i = pl.program_id(0)
    # Unique 32-bit counter per element of the WHOLE array (wraps mod 2^32,
    # which only matters for >4G-element inputs).  Built from the block index
    # so every grid step draws a distinct random stream.
    rows_i = jax.lax.broadcasted_iota(jnp.int32, x_ref.shape, 0)
    cols_i = jax.lax.broadcasted_iota(jnp.int32, x_ref.shape, 1)
    counter = ((i * block_rows + rows_i) * lane_width + cols_i).astype(jnp.uint32)

    seed_u = seed_ref[0].astype(jnp.uint32)
    h = _fmix32(counter ^ (seed_u * jnp.uint32(0x9E3779B9)))

    # keep iff uniform_u32 < keep_prob * 2^32  (unbiased Bernoulli(keep_prob)).
    keep = h < jnp.uint32(threshold_u32)
    scale = jnp.asarray(inv_keep_prob, x_ref.dtype)
    o_ref[...] = jnp.where(keep, x_ref[...] * scale, jnp.zeros((), x_ref.dtype))


def dropout(x, p=0.5, *, seed=0, training=True):
    """Pallas TPU dropout matching the PyTorch module's forward."""
    if not training or p <= 0.0:
        return x
    if p >= 1.0:
        return jnp.zeros_like(x)

    keep_prob = 1.0 - float(p)
    # uint32 threshold for Bernoulli(keep_prob).  Clamping to 2^32-1 means for
    # p ~ 0 a ~2.3e-10 fraction of elements is still dropped — negligible.
    threshold_u32 = min(int(round(keep_prob * (1 << 32))), (1 << 32) - 1)
    inv_keep_prob = 1.0 / keep_prob

    orig_shape = x.shape
    n = x.size
    flat = jnp.ravel(x)

    # Fast path: pick the widest lane-dense slab width that divides n exactly
    # (no pad/de-pad HBM round-trip).  Ragged sizes fall back to padding.
    lane_width = None
    for cand in _LANE_CANDIDATES:
        if n % cand == 0:
            lane_width = cand
            break
    padded = False
    if lane_width is None:
        # TODO(synk): handle the ragged tail with an in-kernel masked store
        # instead of this pad/slice round-trip (extra HBM passes).
        lane_width = 128
        n_pad = pl.cdiv(n, _MIN_TILE) * _MIN_TILE
        flat = jnp.pad(flat, (0, n_pad - n))
        padded = True
    else:
        n_pad = n

    rows = n_pad // lane_width
    slab = flat.reshape(rows, lane_width)

    itemsize = jnp.dtype(x.dtype).itemsize
    # ~1 MiB per block, rows a multiple of 8 (sublane) unless the block covers
    # the full row extent.
    block_rows = max(8, (_TARGET_BLOCK_BYTES // (lane_width * itemsize)) // 8 * 8)
    if block_rows >= rows:
        block_rows = rows
    grid = pl.cdiv(rows, block_rows)

    seed_arr = jnp.asarray([seed], dtype=jnp.int32)
    kernel = functools.partial(
        _dropout_kernel,
        threshold_u32=threshold_u32,
        inv_keep_prob=inv_keep_prob,
        block_rows=block_rows,
        lane_width=lane_width,
    )

    cost = None
    if hasattr(pl, "CostEstimate"):
        cost = pl.CostEstimate(flops=int(3 * n_pad), transcendentals=0,
                               bytes_accessed=int(2 * n_pad * itemsize))

    out_slab = pl.pallas_call(
        kernel,
        out_shape=jax.ShapeDtypeStruct((rows, lane_width), x.dtype),
        grid_spec=pltpu.PrefetchScalarGridSpec(
            num_scalar_prefetch=1,
            grid=(grid,),
            in_specs=[
                pl.BlockSpec((block_rows, lane_width),
                             lambda i, seed_ref: (i, 0)),
            ],
            out_specs=pl.BlockSpec((block_rows, lane_width),
                                   lambda i, seed_ref: (i, 0)),
        ),
        compiler_params=pltpu.CompilerParams(
            dimension_semantics=("parallel",)),
        cost_estimate=cost,
    )(seed_arr, slab)

    out_flat = out_slab.reshape(-1)
    if padded:
        out_flat = out_flat[:n]
    return out_flat.reshape(orig_shape)


if __name__ == "__main__":
    key = jax.random.PRNGKey(0)
    # Small NCHW input consistent with the module's elementwise forward.
    x = jax.random.normal(key, (2, 4, 16, 16), dtype=jnp.float32)

    p = 0.5
    y = dropout(x, p=p, seed=1234, training=True)
    y = jax.block_until_ready(y)

    # Basic sanity checks on dropout semantics.
    assert y.shape == x.shape and y.dtype == x.dtype
    kept = y != 0.0
    # Kept elements must equal x / (1 - p); dropped elements must be zero.
    assert jnp.allclose(jnp.where(kept, y, 0.0),
                        jnp.where(kept, x / (1.0 - p), 0.0),
                        rtol=1e-6, atol=1e-6)
    # Keep fraction should be roughly keep_prob (loose bound, 2048 elems).
    frac_kept = jnp.mean(kept.astype(jnp.float32))
    assert 0.35 < float(frac_kept) < 0.65, float(frac_kept)
    # Eval mode is identity; p >= 1 drops everything.
    y_eval = jax.block_until_ready(dropout(x, p=p, training=False))
    assert jnp.array_equal(y_eval, x)
    y_all = jax.block_until_ready(dropout(x, p=1.0, seed=7, training=True))
    assert jnp.all(y_all == 0.0)

    print("KERNEL_OK")
</pallas_src>

<mosaic_0001>
module attributes {stable_mosaic.version = 11 : i64} {
  func.func @_dropout_kernel(%arg0: i32, %arg1: memref<1xi32, #tpu.memory_space<smem>>, %arg2: memref<1x2048xf32, #tpu.memory_space<vmem>>, %arg3: memref<1x2048xf32, #tpu.memory_space<vmem>>) attributes {dimension_semantics = [#tpu.dimension_semantics<parallel>], iteration_bounds = array<i64: 1>, scalar_prefetch = 1 : i64, scratch_operands = 0 : i64, tpu.core_type = #tpu.core_type<tc>, window_params = [{transform_indices = @transform_0, window_bounds = array<i64: 1, 2048>}, {transform_indices = @transform_1, window_bounds = array<i64: 1, 2048>}]} {
    %0 = tpu.iota {dimensions = array<i32: 0>} : vector<1x2048xi32>
    %1 = tpu.iota {dimensions = array<i32: 1>} : vector<1x2048xi32>
    %c1_i32 = arith.constant 1 : i32
    %2 = arith.muli %arg0, %c1_i32 : i32
    %3 = vector.broadcast %2 : i32 to vector<1x2048xi32>
    %4 = arith.addi %3, %0 : vector<1x2048xi32>
    %c2048_i32 = arith.constant 2048 : i32
    %5 = vector.broadcast %c2048_i32 : i32 to vector<1x2048xi32>
    %6 = arith.muli %4, %5 : vector<1x2048xi32>
    %7 = arith.addi %6, %1 : vector<1x2048xi32>
    %c0 = arith.constant 0 : index
    %8 = memref.load %arg1[%c0] : memref<1xi32, #tpu.memory_space<smem>>
    %c-1640531527_i32 = arith.constant -1640531527 : i32
    %9 = arith.muli %8, %c-1640531527_i32 : i32
    %10 = vector.broadcast %9 : i32 to vector<1x2048xi32>
    %11 = arith.xori %7, %10 : vector<1x2048xi32>
    %c16_i32 = arith.constant 16 : i32
    %12 = vector.broadcast %c16_i32 : i32 to vector<1x2048xi32>
    %13 = arith.shrui %11, %12 : vector<1x2048xi32>
    %14 = arith.xori %11, %13 : vector<1x2048xi32>
    %c-2048144789_i32 = arith.constant -2048144789 : i32
    %15 = vector.broadcast %c-2048144789_i32 : i32 to vector<1x2048xi32>
    %16 = arith.muli %14, %15 : vector<1x2048xi32>
    %c13_i32 = arith.constant 13 : i32
    %17 = vector.broadcast %c13_i32 : i32 to vector<1x2048xi32>
    %18 = arith.shrui %16, %17 : vector<1x2048xi32>
    %19 = arith.xori %16, %18 : vector<1x2048xi32>
    %c-1028477387_i32 = arith.constant -1028477387 : i32
    %20 = vector.broadcast %c-1028477387_i32 : i32 to vector<1x2048xi32>
    %21 = arith.muli %19, %20 : vector<1x2048xi32>
    %c16_i32_0 = arith.constant 16 : i32
    %22 = vector.broadcast %c16_i32_0 : i32 to vector<1x2048xi32>
    %23 = arith.shrui %21, %22 : vector<1x2048xi32>
    %24 = arith.xori %21, %23 : vector<1x2048xi32>
    %c-2147483648_i32 = arith.constant -2147483648 : i32
    %25 = vector.broadcast %c-2147483648_i32 : i32 to vector<1x2048xi32>
    %26 = arith.cmpi ult, %24, %25 : vector<1x2048xi32>
    %c0_1 = arith.constant 0 : index
    %c0_2 = arith.constant 0 : index
    %27 = vector.load %arg2[%c0_1, %c0_2] : memref<1x2048xf32, #tpu.memory_space<vmem>>, vector<1x2048xf32>
    %cst = arith.constant 2.000000e+00 : f32
    %28 = vector.broadcast %cst : f32 to vector<1x2048xf32>
    %29 = arith.mulf %27, %28 : vector<1x2048xf32>
    %cst_3 = arith.constant 0.000000e+00 : f32
    %30 = vector.broadcast %cst_3 : f32 to vector<1x2048xf32>
    %31 = arith.select %26, %29, %30 : vector<1x2048xi1>, vector<1x2048xf32>
    %c0_4 = arith.constant 0 : index
    %c0_5 = arith.constant 0 : index
    %32 = vector.load %arg3[%c0_4, %c0_5] : memref<1x2048xf32, #tpu.memory_space<vmem>>, vector<1x2048xf32>
    tpu.vector_store %arg3[%c0_4, %c0_5], %31 {strides = array<i32>} : memref<1x2048xf32, #tpu.memory_space<vmem>>, vector<1x2048xf32>,
    return
  }
  func.func @transform_0(%arg0: i32, %arg1: memref<1xi32, #tpu.memory_space<smem>>) -> (i32, i32) {
    %c0_i32 = arith.constant 0 : i32
    %c0_i32_0 = arith.constant 0 : i32
    return %arg0, %c0_i32 : i32, i32
  }
  func.func @transform_1(%arg0: i32, %arg1: memref<1xi32, #tpu.memory_space<smem>>) -> (i32, i32) {
    %c0_i32 = arith.constant 0 : i32
    %c0_i32_0 = arith.constant 0 : i32
    return %arg0, %c0_i32 : i32, i32
  }
}

</mosaic_0001>

<bundles_post_ra>
// kernel: tpu_custom_call.1
= control target key start
LH: loop header
LB: loop body
LE: loop exit
PB: predicated region body
PF: predicated region fallthrough
CT: control target
= control target key end

     0   :  { %8 = vsyncpa [#allocation5], 0  ;;  %s622_s0 = inlined_call_operand.<no memory space> [shape: s32[1], index: 0, kind: input, shape index: {}]   ;;  %s623_s1 = inlined_call_operand.hbm [shape: f32[1,2048], index: 1, kind: input, shape index: {}]   ;;  %s624_s2 = inlined_call_operand.hbm [shape: f32[1,2048], index: 2, kind: output, shape index: {}]  }
   0x1   :  { %9 = vsyncpa [#allocation6], 0  ;;  %s506_s9 = smov [#allocation4]  }
   0x2   :  { %s16_s10 = sshll.u32 %s506_s9, 4  ;;  %s17_s10 = int_to_ptr.vmem [resolvable:$true] %s16_s10 }
   0x3   :  { %s470_s11 = scalar_lea.vmem %s17_s10, 256  ;;  %p475_p1 = scmp.lt.s32.totalorder %s17_s10, %s17_s10 }
   0x4   :  { %p471_p0 = scmp.ne.s32.totalorder %s17_s10, %s470_s11  ;;  %p476_p2 = scmp.lt.s32.totalorder %s470_s11, %s470_s11 }
   0x6   :  { %p477_p3 = por %p476_p2, %p475_p1 }
   0x8   :  { %p478_p4 = pnand %p477_p3, %p471_p0 }
   0xa   :  { %481 = shalt.err (!%p478_p4)
}
   0xb   :  { %19 = dma.hbm_to_vmem [thread:$0]  %s623_s1, 256, %s17_s10, [#allocation5]  }
   0xc   :  { %502 = dma.done.wait [#allocation5], 256  }
   0xd   :  { %503 = vsyncadd [#allocation5], 4294967040  ;;  %v23_v0 = vlaneseq  ;;  %s62_s16 = smul.u32 2654435769, %s622_s0  ;;  %v507_v1 = vmov 1966171168  }
   0xe   :  { %v530_v2 = vunpack.c.l.s4 %v507_v1  ;;  %v224_v23 = vld [vmem:[#allocation4] sm:$0xff]  ;;  %v225_v24 = vld [vmem:[#allocation4 + $0x8] sm:$0xff]  ;;  %s508_s0 = smov [#allocation7]  }
   0xf   :  { %v26_v3 = vand.u32 127, %v23_v0  ;;  %v532_v4 = vshrl.u32 %v23_v0, 7  ;;  %v63_v5 = vstv %s62_s16  ;;  %v536_v25 = vmul.f32 2.0, %v224_v23  ;;  %s450_s1 = sshll.u32 %s508_s0, 4  ;;  %s451_s1 = int_to_ptr.vmem [resolvable:$true] %s450_s1 }
  0x10   :  { %v348_v6 = vunpack.c.0.s8 %v530_v2  ;;  %v538_v26 = vmul.f32 2.0, %v225_v24  ;;  %s482_s17 = scalar_lea.vmem %s451_s1, 256  ;;  %p487_p6 = scmp.lt.s32.totalorder %s451_s1, %s451_s1 }
  0x11   :  { %v27_v7 = vadd.s32 128, %v26_v3  ;;  %v28_v8 = vadd.s32 256, %v26_v3  ;;  %v29_v9 = vadd.s32 384, %v26_v3  ;;  %v30_v10 = vadd.s32 512, %v26_v3  ;;  %p483_p5 = scmp.ne.s32.totalorder %s451_s1, %s482_s17  ;;  %p488_p7 = scmp.lt.s32.totalorder %s482_s17, %s482_s17 }
  0x12   :  { %v31_v11 = vadd.s32 640, %v26_v3  ;;  %v32_v12 = vadd.s32 768, %v26_v3  ;;  %v33_v13 = vadd.s32 896, %v26_v3  ;;  %v34_v14 = vadd.s32 1024, %v26_v3 }
  0x13   :  { %v35_v15 = vadd.s32 1152, %v26_v3  ;;  %v36_v16 = vadd.s32 1280, %v26_v3  ;;  %v37_v17 = vadd.s32 1408, %v26_v3  ;;  %v38_v18 = vadd.s32 1536, %v26_v3  ;;  %p489_p8 = por %p488_p7, %p487_p6 }
  0x14   :  { %v39_v19 = vadd.s32 1664, %v26_v3  ;;  %v40_v20 = vadd.s32 1792, %v26_v3  ;;  %v41_v21 = vadd.s32 1920, %v26_v3  ;;  %v44_v22 = vmul.u32 2048, %v532_v4 }
  0x15   :  { %v232_v27 = vsub.s32 0, %v532_v4  ;;  %v236_v28 = vsub.s32 1, %v532_v4  ;;  %p490_p9 = pnand %p489_p8, %p483_p5 }
  0x16   :  { %v45_v29 = vadd.s32 %v44_v22, %v26_v3  ;;  %v46_v30 = vadd.s32 %v44_v22, %v27_v7  ;;  %v47_v31 = vadd.s32 %v44_v22, %v28_v8  ;;  %v48_v32 = vadd.s32 %v44_v22, %v29_v9 }
  0x17   :  { %v49_v33 = vadd.s32 %v44_v22, %v30_v10  ;;  %v50_v34 = vadd.s32 %v44_v22, %v31_v11  ;;  %v51_v35 = vadd.s32 %v44_v22, %v32_v12  ;;  %v52_v36 = vadd.s32 %v44_v22, %v33_v13 }
  0x18   :  { %v53_v37 = vadd.s32 %v44_v22, %v34_v14  ;;  %v54_v38 = vadd.s32 %v44_v22, %v35_v15  ;;  %v55_v39 = vadd.s32 %v44_v22, %v36_v16  ;;  %v56_v40 = vadd.s32 %v44_v22, %v37_v17 }
  0x19   :  { %v57_v41 = vadd.s32 %v44_v22, %v38_v18  ;;  %v58_v42 = vadd.s32 %v44_v22, %v39_v19  ;;  %v59_v43 = vadd.s32 %v44_v22, %v40_v20  ;;  %v60_v44 = vadd.s32 %v44_v22, %v41_v21 }
  0x1a   :  { %v64_v45 = vxor.u32 %v63_v5, %v45_v29  ;;  %v65_v46 = vxor.u32 %v63_v5, %v46_v30  ;;  %v66_v47 = vxor.u32 %v63_v5, %v47_v31  ;;  %v67_v48 = vxor.u32 %v63_v5, %v48_v32 }
  0x1b   :  { %v68_v49 = vxor.u32 %v63_v5, %v49_v33  ;;  %v69_v50 = vxor.u32 %v63_v5, %v50_v34  ;;  %v70_v51 = vxor.u32 %v63_v5, %v51_v35  ;;  %v71_v52 = vxor.u32 %v63_v5, %v52_v36 }
  0x1c   :  { %v72_v53 = vxor.u32 %v63_v5, %v53_v37  ;;  %v73_v54 = vxor.u32 %v63_v5, %v54_v38  ;;  %v74_v55 = vxor.u32 %v63_v5, %v55_v39  ;;  %v75_v56 = vxor.u32 %v63_v5, %v56_v40 }
  0x1d   :  { %v76_v57 = vxor.u32 %v63_v5, %v57_v41  ;;  %v77_v58 = vxor.u32 %v63_v5, %v58_v42  ;;  %v78_v59 = vxor.u32 %v63_v5, %v59_v43  ;;  %v79_v60 = vxor.u32 %v63_v5, %v60_v44 }
  0x1e   :  { %v80_v61 = vshrl.u32 %v64_v45, 16  ;;  %v81_v62 = vshrl.u32 %v65_v46, 16  ;;  %v82_v63 = vshrl.u32 %v66_v47, 16  ;;  %v83_v0 = vshrl.u32 %v67_v48, 16 }
  0x1f   :  { %v84_v1 = vshrl.u32 %v68_v49, 16  ;;  %v85_v3 = vshrl.u32 %v69_v50, 16  ;;  %v86_v7 = vshrl.u32 %v70_v51, 16  ;;  %v87_v8 = vshrl.u32 %v71_v52, 16 }
  0x20   :  { %v88_v9 = vshrl.u32 %v72_v53, 16  ;;  %v89_v10 = vshrl.u32 %v73_v54, 16  ;;  %v90_v11 = vshrl.u32 %v74_v55, 16  ;;  %v91_v12 = vshrl.u32 %v75_v56, 16 }
  0x21   :  { %v92_v13 = vshrl.u32 %v76_v57, 16  ;;  %v93_v14 = vshrl.u32 %v77_v58, 16  ;;  %v94_v15 = vshrl.u32 %v78_v59, 16  ;;  %v95_v16 = vshrl.u32 %v79_v60, 16 }
  0x22   :  { %v96_v17 = vxor.u32 %v80_v61, %v64_v45  ;;  %v97_v18 = vxor.u32 %v81_v62, %v65_v46  ;;  %v98_v19 = vxor.u32 %v82_v63, %v66_v47  ;;  %v99_v5 = vxor.u32 %v83_v0, %v67_v48 }
  0x23   :  { %v100_v20 = vxor.u32 %v84_v1, %v68_v49  ;;  %v101_v21 = vxor.u32 %v85_v3, %v69_v50  ;;  %v102_v22 = vxor.u32 %v86_v7, %v70_v51  ;;  %v103_v23 = vxor.u32 %v87_v8, %v71_v52 }
  0x24   :  { %v104_v24 = vxor.u32 %v88_v9, %v72_v53  ;;  %v105_v29 = vxor.u32 %v89_v10, %v73_v54  ;;  %v106_v30 = vxor.u32 %v90_v11, %v74_v55  ;;  %v107_v31 = vxor.u32 %v91_v12, %v75_v56 }
  0x25   :  { %v108_v32 = vxor.u32 %v92_v13, %v76_v57  ;;  %v109_v33 = vxor.u32 %v93_v14, %v77_v58  ;;  %v110_v34 = vxor.u32 %v94_v15, %v78_v59  ;;  %v111_v35 = vxor.u32 %v95_v16, %v79_v60 }
  0x26   :  { %v112_v36 = vmul.u32 2246822507, %v96_v17  ;;  %v113_v37 = vmul.u32 2246822507, %v97_v18  ;;  %v545_v38 = vrot.slane %v536_v25, %v232_v27  ;;  %v550_v39 = vrot.slane %v536_v25, %v236_v28 }
  0x27   :  { %v114_v40 = vmul.u32 2246822507, %v98_v19  ;;  %v115_v41 = vmul.u32 2246822507, %v99_v5  ;;  %v240_v42 = vsub.s32 2, %v532_v4  ;;  %v244_v43 = vsub.s32 3, %v532_v4 }
  0x28   :  { %v116_v44 = vmul.u32 2246822507, %v100_v20  ;;  %v117_v45 = vmul.u32 2246822507, %v101_v21  ;;  %v128_v46 = vshrl.u32 %v112_v36, 13  ;;  %v129_v47 = vshrl.u32 %v113_v37, 13 }
  0x29   :  { %v118_v48 = vmul.u32 2246822507, %v102_v22  ;;  %v119_v49 = vmul.u32 2246822507, %v103_v23  ;;  %v130_v50 = vshrl.u32 %v114_v40, 13  ;;  %v131_v51 = vshrl.u32 %v115_v41, 13 }
  0x2a   :  { %v120_v52 = vmul.u32 2246822507, %v104_v24  ;;  %v121_v53 = vmul.u32 2246822507, %v105_v29  ;;  %v132_v54 = vshrl.u32 %v116_v44, 13  ;;  %v133_v55 = vshrl.u32 %v117_v45, 13 }
  0x2b   :  { %v122_v56 = vmul.u32 2246822507, %v106_v30  ;;  %v123_v57 = vmul.u32 2246822507, %v107_v31  ;;  %v134_v58 = vshrl.u32 %v118_v48, 13  ;;  %v135_v59 = vshrl.u32 %v119_v49, 13 }
  0x2c   :  { %v124_v60 = vmul.u32 2246822507, %v108_v32  ;;  %v125_v61 = vmul.u32 2246822507, %v109_v33  ;;  %v136_v62 = vshrl.u32 %v120_v52, 13  ;;  %v137_v63 = vshrl.u32 %v121_v53, 13 }
  0x2d   :  { %v126_v0 = vmul.u32 2246822507, %v110_v34  ;;  %v127_v1 = vmul.u32 2246822507, %v111_v35  ;;  %v138_v3 = vshrl.u32 %v122_v56, 13  ;;  %v139_v7 = vshrl.u32 %v123_v57, 13 }
  0x2e   :  { %v140_v8 = vshrl.u32 %v124_v60, 13  ;;  %v141_v9 = vshrl.u32 %v125_v61, 13  ;;  %v144_v10 = vxor.u32 %v128_v46, %v112_v36  ;;  %v145_v11 = vxor.u32 %v129_v47, %v113_v37 }
  0x2f   :  { %v142_v12 = vshrl.u32 %v126_v0, 13  ;;  %v143_v13 = vshrl.u32 %v127_v1, 13  ;;  %v146_v14 = vxor.u32 %v130_v50, %v114_v40  ;;  %v147_v15 = vxor.u32 %v131_v51, %v115_v41 }
  0x30   :  { %v148_v16 = vxor.u32 %v132_v54, %v116_v44  ;;  %v149_v17 = vxor.u32 %v133_v55, %v117_v45  ;;  %v150_v18 = vxor.u32 %v134_v58, %v118_v48  ;;  %v151_v19 = vxor.u32 %v135_v59, %v119_v49 }
  0x31   :  { %v152_v5 = vxor.u32 %v136_v62, %v120_v52  ;;  %v153_v20 = vxor.u32 %v137_v63, %v121_v53  ;;  %v154_v21 = vxor.u32 %v138_v3, %v122_v56  ;;  %v155_v22 = vxor.u32 %v139_v7, %v123_v57 }
  0x32   :  { %v156_v23 = vxor.u32 %v140_v8, %v124_v60  ;;  %v157_v24 = vxor.u32 %v141_v9, %v125_v61  ;;  %v158_v29 = vxor.u32 %v142_v12, %v126_v0  ;;  %v159_v30 = vxor.u32 %v143_v13, %v127_v1 }
  0x33   :  { %v160_v31 = vmul.u32 3266489909, %v144_v10  ;;  %v161_v32 = vmul.u32 3266489909, %v145_v11  ;;  %v557_v33 = vrot.slane %v536_v25, %v240_v42  ;;  %v562_v34 = vrot.slane %v536_v25, %v244_v43 }
  0x34   :  { %v162_v35 = vmul.u32 3266489909, %v146_v14  ;;  %v163_v36 = vmul.u32 3266489909, %v147_v15  ;;  %v248_v37 = vsub.s32 4, %v532_v4  ;;  %v252_v40 = vsub.s32 5, %v532_v4 }
  0x35   :  { %v164_v41 = vmul.u32 3266489909, %v148_v16  ;;  %v165_v44 = vmul.u32 3266489909, %v149_v17  ;;  %v176_v45 = vshrl.u32 %v160_v31, 16  ;;  %v177_v46 = vshrl.u32 %v161_v32, 16 }
  0x36   :  { %v166_v47 = vmul.u32 3266489909, %v150_v18  ;;  %v167_v48 = vmul.u32 3266489909, %v151_v19  ;;  %v178_v49 = vshrl.u32 %v162_v35, 16  ;;  %v179_v50 = vshrl.u32 %v163_v36, 16 }
  0x37   :  { %v168_v51 = vmul.u32 3266489909, %v152_v5  ;;  %v169_v52 = vmul.u32 3266489909, %v153_v20  ;;  %v180_v53 = vshrl.u32 %v164_v41, 16  ;;  %v181_v54 = vshrl.u32 %v165_v44, 16 }
  0x38   :  { %v170_v55 = vmul.u32 3266489909, %v154_v21  ;;  %v171_v56 = vmul.u32 3266489909, %v155_v22  ;;  %v182_v57 = vshrl.u32 %v166_v47, 16  ;;  %v183_v58 = vshrl.u32 %v167_v48, 16 }
  0x39   :  { %v172_v59 = vmul.u32 3266489909, %v156_v23  ;;  %v173_v60 = vmul.u32 3266489909, %v157_v24  ;;  %v184_v61 = vshrl.u32 %v168_v51, 16  ;;  %v185_v62 = vshrl.u32 %v169_v52, 16 }
  0x3a   :  { %v174_v63 = vmul.u32 3266489909, %v158_v29  ;;  %v175_v0 = vmul.u32 3266489909, %v159_v30  ;;  %v186_v1 = vshrl.u32 %v170_v55, 16  ;;  %v187_v3 = vshrl.u32 %v171_v56, 16 }
  0x3b   :  { %v188_v7 = vshrl.u32 %v172_v59, 16  ;;  %v189_v8 = vshrl.u32 %v173_v60, 16  ;;  %v192_v9 = vxor.u32 %v176_v45, %v160_v31  ;;  %v193_v10 = vxor.u32 %v177_v46, %v161_v32 }
  0x3c   :  { %v190_v11 = vshrl.u32 %v174_v63, 16  ;;  %v191_v12 = vshrl.u32 %v175_v0, 16  ;;  %v194_v13 = vxor.u32 %v178_v49, %v162_v35  ;;  %v195_v14 = vxor.u32 %v179_v50, %v163_v36 }
  0x3d   :  { %v196_v15 = vxor.u32 %v180_v53, %v164_v41  ;;  %v197_v16 = vxor.u32 %v181_v54, %v165_v44  ;;  %v198_v17 = vxor.u32 %v182_v57, %v166_v47  ;;  %v199_v18 = vxor.u32 %v183_v58, %v167_v48 }
  0x3e   :  { %v200_v19 = vxor.u32 %v184_v61, %v168_v51  ;;  %v201_v5 = vxor.u32 %v185_v62, %v169_v52  ;;  %v202_v20 = vxor.u32 %v186_v1, %v170_v55  ;;  %v203_v21 = vxor.u32 %v187_v3, %v171_v56 }
  0x3f   :  { %v204_v22 = vxor.u32 %v188_v7, %v172_v59  ;;  %v205_v23 = vxor.u32 %v189_v8, %v173_v60  ;;  %v206_v24 = vxor.u32 %v190_v11, %v174_v63  ;;  %v207_v29 = vxor.u32 %v191_v12, %v175_v0 }
  0x40   :  { %vm208_vm0 = vcmp.lt.u32.totalorder %v192_v9, 2147483648  ;;  %vm209_vm1 = vcmp.lt.u32.totalorder %v193_v10, 2147483648  ;;  %vm210_vm2 = vcmp.lt.u32.totalorder %v194_v13, 2147483648  ;;  %vm211_vm3 = vcmp.lt.u32.totalorder %v195_v14, 2147483648 }
  0x41   :  { %vm212_vm4 = vcmp.lt.u32.totalorder %v196_v15, 2147483648  ;;  %vm213_vm5 = vcmp.lt.u32.totalorder %v197_v16, 2147483648  ;;  %vm214_vm6 = vcmp.lt.u32.totalorder %v198_v17, 2147483648  ;;  %vm215_vm7 = vcmp.lt.u32.totalorder %v199_v18, 2147483648 }
  0x42   :  { %vm216_vm8 = vcmp.lt.u32.totalorder %v200_v19, 2147483648  ;;  %vm217_vm9 = vcmp.lt.u32.totalorder %v201_v5, 2147483648  ;;  %vm218_vm10 = vcmp.lt.u32.totalorder %v202_v20, 2147483648  ;;  %vm219_vm11 = vcmp.lt.u32.totalorder %v203_v21, 2147483648 }
  0x43   :  { %vm220_vm12 = vcmp.lt.u32.totalorder %v204_v22, 2147483648  ;;  %vm221_vm13 = vcmp.lt.u32.totalorder %v205_v23, 2147483648  ;;  %vm222_vm14 = vcmp.lt.u32.totalorder %v206_v24, 2147483648  ;;  %vm223_vm15 = vcmp.lt.u32.totalorder %v207_v29, 2147483648 }
  0x44   :  { %v249_v30 = vrot.slane %v536_v25, %v248_v37  ;;  %v253_v31 = vrot.slane %v536_v25, %v252_v40  ;;  %v256_v32 = vsub.s32 6, %v532_v4  ;;  %v260_v35 = vsub.s32 7, %v532_v4 }
  0x45   :  { %v265_v36 = vrot.slane %v538_v26, %v232_v27  ;;  %v269_v41 = vrot.slane %v538_v26, %v236_v28  ;;  %v273_v44 = vrot.slane %v538_v26, %v240_v42  ;;  %v277_v45 = vrot.slane %v538_v26, %v244_v43 }
  0x46   :  { %v257_v46 = vrot.slane %v536_v25, %v256_v32  ;;  %v261_v47 = vrot.slane %v536_v25, %v260_v35  ;;  %v281_v27 = vrot.slane %v538_v26, %v248_v37  ;;  %v285_v28 = vrot.slane %v538_v26, %v252_v40 }
  0x47   :  { %v289_v48 = vrot.slane %v538_v26, %v256_v32  ;;  %v293_v42 = vrot.slane %v538_v26, %v260_v35  ;;  %v310_v49 = vsel %vm208_vm0, %v545_v38, 0.0  ;;  %v311_v43 = vsel %vm209_vm1, %v550_v39, 0.0 }
  0x48   :  { %v312_v25 = vsel %vm210_vm2, %v557_v33, 0.0  ;;  %v313_v37 = vsel %vm211_vm3, %v562_v34, 0.0  ;;  %v314_v50 = vsel %vm212_vm4, %v249_v30, 0.0  ;;  %v315_v40 = vsel %vm213_vm5, %v253_v31, 0.0 }
  0x49   :  { %v316_v51 = vsel %vm214_vm6, %v257_v46, 0.0  ;;  %v317_v26 = vsel %vm215_vm7, %v261_v47, 0.0  ;;  %v318_v52 = vsel %vm216_vm8, %v265_v36, 0.0  ;;  %v319_v38 = vsel %vm217_vm9, %v269_v41, 0.0 }
  0x4a   :  { %v320_v39 = vsel %vm218_vm10, %v273_v44, 0.0  ;;  %v321_v53 = vsel %vm219_vm11, %v277_v45, 0.0  ;;  %v322_v33 = vsel %vm220_vm12, %v281_v27, 0.0  ;;  %v323_v34 = vsel %vm221_vm13, %v285_v28, 0.0 }
  0x4b   :  { %v324_v54 = vsel %vm222_vm14, %v289_v48, 0.0  ;;  %v325_v55 = vsel %vm223_vm15, %v293_v42, 0.0  ;;  %v342_v56 = vcombine.low %v310_v49, %v311_v43  ;;  %v343_v57 = vcombine.low %v312_v25, %v313_v37 }
  0x4c   :  { %v344_v58 = vcombine.low %v314_v50, %v315_v40  ;;  %v345_v59 = vcombine.low %v316_v51, %v317_v26  ;;  %v351_v60 = vsub.s32 %v348_v6, %v532_v4  ;;  %v391_v61 = vcombine.low %v318_v52, %v319_v38 }
  0x4d   :  { %v392_v62 = vcombine.low %v320_v39, %v321_v53  ;;  %v393_v63 = vcombine.low %v322_v33, %v323_v34  ;;  %v394_v0 = vcombine.low %v324_v54, %v325_v55 }
  0x4e   :  { %v352_v1 = vrot.slane %v342_v56, %v351_v60  ;;  %v359_v3 = vrot.slane %v343_v57, %v351_v60  ;;  %v366_v7 = vrot.slane %v344_v58, %v351_v60  ;;  %v373_v8 = vrot.slane %v345_v59, %v351_v60 }
  0x4f   :  { %v401_v9 = vrot.slane %v391_v61, %v351_v60  ;;  %v408_v10 = vrot.slane %v392_v62, %v351_v60  ;;  %v415_v11 = vrot.slane %v393_v63, %v351_v60  ;;  %v422_v12 = vrot.slane %v394_v0, %v351_v60 }
  0x50   :  { %v374_v13 = vcombine.low %v352_v1, %v359_v3  ;;  %v375_v14 = vcombine.low %v366_v7, %v373_v8 }
  0x51   :  { %v423_v15 = vcombine.low %v401_v9, %v408_v10  ;;  %v424_v16 = vcombine.low %v415_v11, %v422_v12 }
  0x52   :  { %v382_v17 = vrot.slane %v374_v13, %v351_v60  ;;  %v389_v18 = vrot.slane %v375_v14, %v351_v60 }
  0x53   :  { %v431_v2 = vrot.slane %v423_v15, %v351_v60  ;;  %v438_v4 = vrot.slane %v424_v16, %v351_v60 }
  0x54   :  { %v390_v6 = vcombine.low %v382_v17, %v389_v18 }
  0x55   :  { %v439_v19 = vcombine.low %v431_v2, %v438_v4 }
  0x56   :  { %442 = vst [vmem:[#allocation7] sm:$0xff] %v390_v6 }
  0x57   :  { %443 = vst [vmem:[#allocation7 + $0x8] sm:$0xff] %v439_v19 }
  0x58   :  { %493 = shalt.err (!%p490_p9)
}
  0x59   :  { %453 = dma.vmem_to_hbm [thread:$0]  %s451_s1, 256, %s624_s2, [#allocation6]  }
  0x5a   :  { %504 = dma.done.wait [#allocation6], 256  }
  0x5b   :  { %505 = vsyncadd [#allocation6], 4294967040 }
  0x5c   :  { %457 = vsyncpa [#allocation5], 1 }
  0x5d   :  { %458 = vsyncpa [#allocation6], 1 }

</bundles_post_ra>
